<compile_context>
chip_gen: v7x
topology: tpu7x:2x2x1
jax: 0.10.0
libtpu: 0.0.40
codegen_flags: <defaults>
</compile_context>

<pallas_src>
import jax
import jax.numpy as jnp
from jax.experimental import pallas as pl
from jax.experimental.pallas import tpu as pltpu

_MIB = 1024 * 1024
# Below this total size the kernel is pure launch/pipeline overhead.
_SMALL_PROBLEM_BYTES = 512 * 1024


def hadamard_kernel(w_ref, x_ref, o_ref):
    # w_ref: (1,  N*D)  pre-averaged weights (constant across the grid)
    # x_ref: (TB, N*D)  batch tile
    # o_ref: (TB, N*D)  output tile
    o_ref[...] = x_ref[...] * w_ref[...]


def _chip_params():
    """Generation-aware (target_tile_bytes, scoped_vmem_cap_bytes)."""
    kind = ""
    try:
        kind = (jax.devices()[0].device_kind or "").lower()
    except Exception:
        pass
    if "v7" in kind:
        # 2 TC, 64 MiB VMEM/TC, ~3.2 TB/s HBM: big tiles to amortize the
        # ~0.35 us per-step cost; keep scoped VMEM below the 64 MiB physical.
        return 8 * _MIB, 56 * _MIB
    if "v6" in kind:
        # 128 MiB VMEM, ~1.4 TB/s HBM.
        return 8 * _MIB, 96 * _MIB
    if "v5" in kind:
        # v5e: ~0.82 TB/s HBM -- a 2 MiB tile already amortizes step overhead.
        return 2 * _MIB, 96 * _MIB
    # Unknown part: conservative (assume smallest physical VMEM, 64 MiB).
    return 4 * _MIB, 48 * _MIB


def _pick_batch_tile(B, row_bytes, target_tile_bytes):
    """Rows per grid step: biggest tile under the target, sublane-aligned."""
    tb = max(1, target_tile_bytes // max(row_bytes, 1))
    if tb >= B:
        return B                      # single full-extent block
    tb = max(8, (tb // 8) * 8)        # multiple of 8 -> unmasked sublane access
    return min(tb, B)


def hadamard_product_layer(x, weights, *, force_pallas=False,
                           max_rows_per_step=None):
    """x: (B, N, D); weights: (H, N, D) -> (B, N, D) = mean_h(weights[h] * x)."""
    B, N, D = x.shape
    ND = N * D

    # Head-mean fold, accumulated in float32 (safe for bf16 weights), computed
    # once outside the hot loop.
    w_mean = jnp.mean(weights.astype(jnp.float32), axis=0)
    w_mean = w_mean.reshape(1, ND).astype(x.dtype)
    x2 = x.reshape(B, ND)

    row_bytes = ND * x.dtype.itemsize
    total_bytes = B * row_bytes

    # Small-problem fast path: at a few hundred KiB or less the fused XLA
    # elementwise op beats any kernel launch.
    if total_bytes < _SMALL_PROBLEM_BYTES and not force_pallas:
        return (x2 * w_mean).reshape(B, N, D)

    target_tile_bytes, vmem_cap = _chip_params()
    tb = _pick_batch_tile(B, row_bytes, target_tile_bytes)
    if max_rows_per_step is not None:      # test / tuning override
        tb = min(tb, max(1, int(max_rows_per_step)))
    grid = (pl.cdiv(B, tb),)               # ragged last block is masked by Pallas

    # Constant-index weight block: the pipeline never re-fetches it; once it is
    # large enough to matter, also drop the pointless second buffer.
    # TODO(synk): if N*D < 128 (or not a multiple of 128) group G batch rows per
    # lane-row (reshape to (B/G, G*N*D), tile w_mean) to keep stores lane-dense.
    w_bytes = ND * x.dtype.itemsize
    if w_bytes > _MIB:
        w_spec = pl.BlockSpec((1, ND), lambda b: (0, 0),
                              pipeline_mode=pl.Buffered(1))
        w_buffers = 1
    else:
        w_spec = pl.BlockSpec((1, ND), lambda b: (0, 0))
        w_buffers = 2

    tile_bytes = tb * row_bytes
    needed_vmem = 4 * tile_bytes + w_buffers * w_bytes + 2 * _MIB
    vmem_limit = int(min(vmem_cap, max(needed_vmem, 32 * _MIB)))

    out = pl.pallas_call(
        hadamard_kernel,
        out_shape=jax.ShapeDtypeStruct((B, ND), x.dtype),
        grid_spec=pltpu.PrefetchScalarGridSpec(
            num_scalar_prefetch=0,
            grid=grid,
            in_specs=[
                w_spec,
                pl.BlockSpec((tb, ND), lambda b: (b, 0)),
            ],
            out_specs=pl.BlockSpec((tb, ND), lambda b: (b, 0)),
        ),
        compiler_params=pltpu.CompilerParams(
            dimension_semantics=("parallel",),
            vmem_limit_bytes=vmem_limit,
        ),
    )(w_mean, x2)
    return out.reshape(B, N, D)


if __name__ == "__main__":
    # Module config: num_head=2 heads of shape (num_nodes, in_dim).
    num_head = 2
    num_nodes = 16
    in_dim = 32

    key = jax.random.PRNGKey(0)
    kw, kx1, kx2 = jax.random.split(key, 3)
    weights = jax.random.normal(kw, (num_head, num_nodes, in_dim), jnp.float32)

    def ref_fwd(xv):
        return jnp.mean(weights[:, None] * xv[None], axis=0)   # (B, N, D)

    # 1) Shipped tiny config (batch=2): wrapper takes the XLA fast path.
    x_small = jax.random.normal(kx1, (2, num_nodes, in_dim), jnp.float32)
    out_small = jax.block_until_ready(hadamard_product_layer(x_small, weights))
    assert out_small.shape == x_small.shape
    assert jnp.allclose(out_small, ref_fwd(x_small), atol=1e-5, rtol=1e-5)

    # 2) Force the Pallas kernel on the tiny config: single full-extent block.
    out_small_k = jax.block_until_ready(
        hadamard_product_layer(x_small, weights, force_pallas=True))
    assert jnp.allclose(out_small_k, ref_fwd(x_small), atol=1e-5, rtol=1e-5)

    # 3) Force the Pallas kernel on an awkward batch with a small tile cap to
    #    exercise the cdiv grid + masked ragged last block (tb=8, 5 steps).
    x_big = jax.random.normal(kx2, (37, num_nodes, in_dim), jnp.float32)
    out_big = jax.block_until_ready(
        hadamard_product_layer(x_big, weights, force_pallas=True,
                               max_rows_per_step=8))
    assert out_big.shape == x_big.shape
    assert jnp.allclose(out_big, ref_fwd(x_big), atol=1e-5, rtol=1e-5)

    print("KERNEL_OK")
</pallas_src>

<mosaic_0001>
module attributes {stable_mosaic.version = 11 : i64} {
  func.func @hadamard_kernel(%arg0: i32, %arg1: memref<1x512xf32, #tpu.memory_space<vmem>>, %arg2: memref<2x512xf32, #tpu.memory_space<vmem>>, %arg3: memref<2x512xf32, #tpu.memory_space<vmem>>) attributes {dimension_semantics = [#tpu.dimension_semantics<parallel>], iteration_bounds = array<i64: 1>, scalar_prefetch = 0 : i64, scratch_operands = 0 : i64, tpu.core_type = #tpu.core_type<tc>, window_params = [{pipeline_mode = #tpu.pipeline_mode<synchronous>, transform_indices = @transform_0, window_bounds = array<i64: 1, 512>}, {transform_indices = @transform_1, window_bounds = array<i64: 2, 512>}, {transform_indices = @transform_2, window_bounds = array<i64: 2, 512>}]} {
    %c0 = arith.constant 0 : index
    %c0_0 = arith.constant 0 : index
    %0 = vector.load %arg2[%c0, %c0_0] : memref<2x512xf32, #tpu.memory_space<vmem>>, vector<2x512xf32>
    %c0_1 = arith.constant 0 : index
    %c0_2 = arith.constant 0 : index
    %1 = vector.load %arg1[%c0_1, %c0_2] : memref<1x512xf32, #tpu.memory_space<vmem>>, vector<1x512xf32>
    %2 = vector.broadcast %1 : vector<1x512xf32> to vector<2x512xf32>
    %3 = arith.mulf %0, %2 : vector<2x512xf32>
    %c0_3 = arith.constant 0 : index
    %c0_4 = arith.constant 0 : index
    %4 = vector.load %arg3[%c0_3, %c0_4] : memref<2x512xf32, #tpu.memory_space<vmem>>, vector<2x512xf32>
    tpu.vector_store %arg3[%c0_3, %c0_4], %3 {strides = array<i32>} : memref<2x512xf32, #tpu.memory_space<vmem>>, vector<2x512xf32>,
    return
  }
  func.func @transform_0(%arg0: i32) -> (i32, i32) {
    %c0_i32 = arith.constant 0 : i32
    %c0_i32_0 = arith.constant 0 : i32
    %c0_i32_1 = arith.constant 0 : i32
    return %c0_i32, %c0_i32_0 : i32, i32
  }
  func.func @transform_1(%arg0: i32) -> (i32, i32) {
    %c0_i32 = arith.constant 0 : i32
    %c0_i32_0 = arith.constant 0 : i32
    return %arg0, %c0_i32 : i32, i32
  }
  func.func @transform_2(%arg0: i32) -> (i32, i32) {
    %c0_i32 = arith.constant 0 : i32
    %c0_i32_0 = arith.constant 0 : i32
    return %arg0, %c0_i32 : i32, i32
  }
}

</mosaic_0001>

<bundles_post_ra>
// kernel: tpu_custom_call.1
= control target key start
LH: loop header
LB: loop body
LE: loop exit
PB: predicated region body
PF: predicated region fallthrough
CT: control target
= control target key end

     0   :  { %7 = vsyncpa [#allocation3], 0  ;;  %s222_s0 = inlined_call_operand.hbm [shape: f32[1,512], index: 0, kind: input, shape index: {}]   ;;  %s223_s1 = inlined_call_operand.hbm [shape: f32[2,512], index: 1, kind: input, shape index: {}]   ;;  %s224_s2 = inlined_call_operand.hbm [shape: f32[2,512], index: 2, kind: output, shape index: {}]  }
   0x1   :  { %8 = vsyncpa [#allocation6], 0 }
   0x2   :  { %9 = vsyncpa [#allocation4], 0  ;;  %s167_s9 = smov [#allocation2]   ;;  %s168_s11 = smov [#allocation5]  }
   0x3   :  { %s16_s10 = sshll.u32 %s167_s9, 4  ;;  %s26_s12 = sshll.u32 %s168_s11, 4  ;;  %s17_s10 = int_to_ptr.vmem [resolvable:$true] %s16_s10  ;;  %s27_s12 = int_to_ptr.vmem [resolvable:$true] %s26_s12 }
   0x4   :  { %s95_s15 = scalar_lea.hbm %s222_s0, 64 }
   0x5   :  { %p96_p0 = scmp.ne.s32.totalorder %s222_s0, %s95_s15  ;;  %p99_p1 = scmp.lt.u32.totalorder %s95_s15, %s222_s0 }
   0x7   :  { %p101_p2 = pnand %p99_p1, %p96_p0 }
   0x9   :  { %104 = shalt.err (!%p101_p2)
}
   0xa   :  { %s105_s20 = scalar_lea.vmem %s17_s10, 64  ;;  %p110_p4 = scmp.lt.s32.totalorder %s17_s10, %s17_s10 }
   0xb   :  { %p106_p3 = scmp.ne.s32.totalorder %s17_s10, %s105_s20  ;;  %p111_p5 = scmp.lt.s32.totalorder %s105_s20, %s105_s20 }
   0xd   :  { %p112_p6 = por %p111_p5, %p110_p4 }
   0xf   :  { %p113_p7 = pnand %p112_p6, %p106_p3 }
  0x11   :  { %116 = shalt.err (!%p113_p7)
}
  0x12   :  { %19 = dma.hbm_to_vmem [thread:$0]  %s222_s0, 64, %s17_s10, [#allocation3]  }
  0x13   :  { %s117_s25 = scalar_lea.hbm %s223_s1, 128 }
  0x14   :  { %p118_p8 = scmp.ne.s32.totalorder %s223_s1, %s117_s25  ;;  %p121_p9 = scmp.lt.u32.totalorder %s117_s25, %s223_s1 }
  0x16   :  { %p123_p10 = pnand %p121_p9, %p118_p8 }
  0x18   :  { %126 = shalt.err (!%p123_p10)
}
  0x19   :  { %s127_s30 = scalar_lea.vmem %s27_s12, 128  ;;  %p132_p12 = scmp.lt.s32.totalorder %s27_s12, %s27_s12 }
  0x1a   :  { %p128_p11 = scmp.ne.s32.totalorder %s27_s12, %s127_s30  ;;  %p133_p13 = scmp.lt.s32.totalorder %s127_s30, %s127_s30 }
  0x1c   :  { %p134_p0 = por %p133_p13, %p132_p12 }
  0x1e   :  { %p135_p1 = pnand %p134_p0, %p128_p11 }
  0x20   :  { %138 = shalt.err (!%p135_p1)
}
  0x21   :  { %29 = dma.hbm_to_vmem [thread:$0]  %s223_s1, 128, %s27_s12, [#allocation6]  }
  0x22   :  { %161 = dma.done.wait [#allocation3], 64  }
  0x23   :  { %162 = vsyncadd [#allocation3], 4294967232 }
  0x24   :  { %163 = dma.done.wait [#allocation6], 128  }
  0x25   :  { %164 = vsyncadd [#allocation6], 4294967168  ;;  %v39_v0 = vlaneseq  ;;  %v169_v1 = vmov 1983009808   ;;  %v37_v9 = vld [vmem:[#allocation2] sm:$0xf] }
  0x26   :  { %v58_v2 = vunpack.c.l.s4 %v169_v1  ;;  %v36_v19 = vld [vmem:[#allocation5] sm:$0xff]  ;;  %s170_s1 = smov [#allocation7]  }
  0x27   :  { %v40_v3 = vshrl.u32 %v39_v0, 7  ;;  %s81_s4 = sshll.u32 %s170_s1, 4  ;;  %s82_s4 = int_to_ptr.vmem [resolvable:$true] %s81_s4 }
  0x28   :  { %v59_v4 = vunpack.c.0.s8 %v58_v2  ;;  %s139_s5 = scalar_lea.vmem %s82_s4, 128  ;;  %p144_p3 = scmp.lt.s32.totalorder %s82_s4, %s82_s4 }
  0x29   :  { %v41_v5 = vsub.s32 0, %v40_v3  ;;  %v45_v6 = vsub.s32 1, %v40_v3  ;;  %v49_v7 = vsub.s32 2, %v40_v3  ;;  %v53_v8 = vsub.s32 3, %v40_v3  ;;  %p140_p2 = scmp.ne.s32.totalorder %s82_s4, %s139_s5  ;;  %p145_p4 = scmp.lt.s32.totalorder %s139_s5, %s139_s5 }
  0x2a   :  { %v62_v10 = vsub.s32 %v59_v4, %v40_v3 }
  0x2b   :  { %v42_v11 = vrot.slane %v37_v9, %v41_v5  ;;  %v46_v12 = vrot.slane %v37_v9, %v45_v6  ;;  %v50_v13 = vrot.slane %v37_v9, %v49_v7  ;;  %v54_v14 = vrot.slane %v37_v9, %v53_v8  ;;  %p146_p5 = por %p145_p4, %p144_p3 }
  0x2d   :  { %v55_v15 = vcombine.low %v42_v11, %v46_v12  ;;  %v56_v16 = vcombine.low %v50_v13, %v54_v14  ;;  %p147_p6 = pnand %p146_p5, %p140_p2 }
  0x2f   :  { %v63_v17 = vrot.slane %v55_v15, %v62_v10  ;;  %v70_v18 = vrot.slane %v56_v16, %v62_v10 }
  0x31   :  { %v71_v20 = vcombine.low %v63_v17, %v70_v18 }
  0x33   :  { %v73_v21 = vmul.f32 %v71_v20, %v36_v19 }
  0x35   :  { %74 = vst [vmem:[#allocation7] sm:$0xff] %v73_v21 }
  0x36   :  { %150 = shalt.err (!%p147_p6)
}
  0x37   :  { %s151_s8 = scalar_lea.hbm %s224_s2, 128 }
  0x38   :  { %p152_p7 = scmp.ne.s32.totalorder %s224_s2, %s151_s8  ;;  %p155_p8 = scmp.lt.u32.totalorder %s151_s8, %s224_s2 }
  0x3a   :  { %p157_p9 = pnand %p155_p8, %p152_p7 }
  0x3c   :  { %160 = shalt.err (!%p157_p9)
}
  0x3d   :  { %84 = dma.vmem_to_hbm [thread:$0]  %s82_s4, 128, %s224_s2, [#allocation4]  }
  0x3e   :  { %165 = dma.done.wait [#allocation4], 128  }
  0x3f   :  { %166 = vsyncadd [#allocation4], 4294967168 }
  0x40   :  { %88 = vsyncpa [#allocation3], 1 }
  0x41   :  { %89 = vsyncpa [#allocation6], 1 }
  0x42   :  { %90 = vsyncpa [#allocation4], 1 }

</bundles_post_ra>
